<compile_context>
chip_gen: v5e
topology: v5e:2x2
jax: 0.10.0
libtpu: 0.0.40
codegen_flags: <defaults>
</compile_context>

<pallas_src>
import functools

import jax
import jax.numpy as jnp
from jax import lax
from jax.experimental import pallas as pl
from jax.experimental.pallas import tpu as pltpu


# ----------------------------------------------------------------------------
# small helpers
# ----------------------------------------------------------------------------
def _round_up(x, m):
    return ((x + m - 1) // m) * m


def _cpad(c):
    # Pad channel counts below 128 up to 128 so kernel outputs are lane-dense
    # (unmasked vst).  Every other ResNet50 channel count is already a
    # multiple of 128.  Padded channels carry zero weights/bias so they stay 0.
    return 128 if c < 128 else c


@functools.lru_cache(maxsize=None)
def _tpu_budgets():
    """(vmem_limit_bytes, per-tile activation byte budget), per TPU generation.

    v5e / v6e have 128 MiB physical VMEM -> large scoped limit and big row
    tiles; v7x has 64 MiB per TensorCore -> keep the conservative budget.
    Falls back to the conservative (known-good) budget if the query fails.
    """
    try:
        info = pltpu.get_tpu_info()
        cap = getattr(info, "vmem_capacity_bytes", None)
    except Exception:
        cap = None
    if cap is None or cap <= (64 << 20):
        return 32 << 20, 2 << 20
    return 96 << 20, 6 << 20


# ----------------------------------------------------------------------------
# Pallas kernels
# ----------------------------------------------------------------------------
def _mm_kernel(a_ref, w_ref, b_ref, o_ref, *, relu):
    acc = jnp.dot(a_ref[...], w_ref[...], preferred_element_type=jnp.float32)
    acc = acc + b_ref[...]
    if relu:
        acc = jnp.maximum(acc, 0.0)
    o_ref[...] = acc.astype(o_ref.dtype)


def _mm_res_kernel(a_ref, w_ref, b_ref, r_ref, o_ref, *, relu):
    # 1x1 conv + folded-BN bias + residual add + ReLU fused in one kernel.
    acc = jnp.dot(a_ref[...], w_ref[...], preferred_element_type=jnp.float32)
    acc = acc + b_ref[...] + r_ref[...].astype(jnp.float32)
    if relu:
        acc = jnp.maximum(acc, 0.0)
    o_ref[...] = acc.astype(o_ref.dtype)


def _conv_tap_kernel(x_ref, w_ref, b_ref, o_ref, *, tap_start, Mstripe,
                     n_stripes, relu):
    # x_ref: (1, Ltot, Cin)   merged tap buffers, resident per batch element
    # w_ref: (9, Cin, TN)     per-tap weight slices (BN scale folded)
    # b_ref: (1, TN)          folded-BN bias (f32)
    # o_ref: (1, Mstripe, TN) output row stripe
    # Tap t = dy*3+dx reads the contiguous row slab [tap_start[t]+m0, +Mstripe)
    # of the merged buffer.  The 9 partial sums are chained in a register/MRB
    # resident f32 value (no per-tap VMEM accumulator round trips).
    if n_stripes == 1:
        m0 = 0
    else:
        m0 = pl.program_id(2) * Mstripe
        if Mstripe % 8 == 0:
            m0 = pl.multiple_of(m0, 8)
    acc = None
    for t in range(9):
        a = x_ref[0, pl.ds(tap_start[t] + m0, Mstripe), :]
        part = jnp.dot(a, w_ref[t], preferred_element_type=jnp.float32)
        acc = part if acc is None else acc + part
    acc = acc + b_ref[...]
    if relu:
        acc = jnp.maximum(acc, 0.0)
    o_ref[0] = acc.astype(o_ref.dtype)


# ----------------------------------------------------------------------------
# fused matmul (1x1 convs, stem, FC): pallas_call builders (cached per shape)
# ----------------------------------------------------------------------------
@functools.lru_cache(maxsize=None)
def _build_matmul(Mp, TM, K, N, TN, relu, has_res, out_dtype, n_outer):
    vmem_limit, _ = _tpu_budgets()
    if n_outer:                       # weight tile resident, activation streamed
        grid = (N // TN, Mp // TM)
        a_map = lambda j, i: (i, 0)
        w_map = lambda j, i: (0, j)
        b_map = lambda j, i: (0, j)
        o_map = lambda j, i: (i, j)
    else:                             # activation row tile resident, weights streamed
        grid = (Mp // TM, N // TN)
        a_map = lambda i, j: (i, 0)
        w_map = lambda i, j: (0, j)
        b_map = lambda i, j: (0, j)
        o_map = lambda i, j: (i, j)
    in_specs = [
        pl.BlockSpec((TM, K), a_map),     # activation row tile
        pl.BlockSpec((K, TN), w_map),     # weight column tile
        pl.BlockSpec((1, TN), b_map),     # folded-BN bias
    ]
    if has_res:
        in_specs.append(pl.BlockSpec((TM, TN), o_map))    # residual
        kern = functools.partial(_mm_res_kernel, relu=relu)
    else:
        kern = functools.partial(_mm_kernel, relu=relu)
    return pl.pallas_call(
        kern,
        out_shape=jax.ShapeDtypeStruct((Mp, N), out_dtype),
        grid_spec=pltpu.PrefetchScalarGridSpec(
            num_scalar_prefetch=0,
            grid=grid,
            in_specs=in_specs,
            out_specs=pl.BlockSpec((TM, TN), o_map),
        ),
        compiler_params=pltpu.CompilerParams(
            dimension_semantics=("parallel", "parallel"),
            vmem_limit_bytes=vmem_limit,
        ),
    )


def _choose_tm(Mp, K, TN, tile_bytes_cap):
    # Mp is a multiple of 16.  Budget covers the bf16 A tile plus the out and
    # residual tiles; TM is picked among divisors of Mp so no pad/copy pass is
    # needed and the grid keeps >=2 row tiles when M is large (megacore).
    cap = tile_bytes_cap // (2 * (K + 3 * TN))
    cap = max(16, (cap // 16) * 16)
    target = min(Mp if Mp <= 256 else max(16, Mp // 2), cap)
    tm, t = 16, 16
    while t <= target:
        if Mp % t == 0:
            tm = t
        t += 16
    return tm


def matmul_fused(a, w, bias, residual=None, relu=True, out_dtype=jnp.bfloat16):
    """act((a @ w) + bias [+ residual]); bf16 MXU, f32 accumulate/epilogue."""
    M, K = a.shape
    K2, N = w.shape
    assert K == K2
    a = a.astype(jnp.bfloat16)
    if residual is not None:
        residual = residual.astype(jnp.bfloat16)

    _, tile_cap = _tpu_budgets()
    TN = 256 if (N > 256 and N % 256 == 0) else N
    Mp = _round_up(M, 16)
    TM = _choose_tm(Mp, K, TN, tile_cap)
    # v7x: if the grid collapses to a single tile, split N so both TCs get work
    if Mp // TM == 1 and N // TN == 1 and N >= 256 and (N // 2) % 128 == 0:
        TN = N // 2
    if Mp != M:                       # at most 15 rows of zero padding
        a = jnp.pad(a, ((0, Mp - M), (0, 0)))
        if residual is not None:
            residual = jnp.pad(residual, ((0, Mp - M), (0, 0)))
    grid_m, grid_n = Mp // TM, N // TN
    # Pick the grid order that minimizes re-streamed HBM bytes:
    #   M-outer: A streamed once, W re-streamed per row tile
    #   N-outer: W streamed once, A re-streamed per column tile
    n_outer = (grid_n * Mp * K + K * N) < (Mp * K + grid_m * K * N)

    call = _build_matmul(int(Mp), int(TM), int(K), int(N), int(TN),
                         bool(relu), residual is not None, out_dtype,
                         bool(n_outer))
    args = (a, w, bias) if residual is None else (a, w, bias, residual)
    out = call(*args)
    return out if Mp == M else out[:M]


# ----------------------------------------------------------------------------
# 3x3 conv: tap-accumulation kernel builders (cached per shape)
# ----------------------------------------------------------------------------
@functools.lru_cache(maxsize=None)
def _build_conv3x3(B, Ltot, Cin, Cout, TN, Mfull, Mstripe, tap_start, relu):
    vmem_limit, _ = _tpu_budgets()
    n_stripes = Mfull // Mstripe
    grid = (B, Cout // TN, n_stripes)
    return pl.pallas_call(
        functools.partial(_conv_tap_kernel, tap_start=tap_start,
                          Mstripe=Mstripe, n_stripes=n_stripes, relu=relu),
        out_shape=jax.ShapeDtypeStruct((B, Mfull, Cout), jnp.bfloat16),
        grid_spec=pltpu.PrefetchScalarGridSpec(
            num_scalar_prefetch=0,
            grid=grid,
            in_specs=[
                pl.BlockSpec((1, Ltot, Cin), lambda b, n, s: (b, 0, 0)),
                pl.BlockSpec((9, Cin, TN), lambda b, n, s: (0, 0, n)),
                pl.BlockSpec((1, TN), lambda b, n, s: (0, n)),
            ],
            out_specs=pl.BlockSpec((1, Mstripe, TN), lambda b, n, s: (b, s, n)),
        ),
        compiler_params=pltpu.CompilerParams(
            dimension_semantics=("parallel", "parallel", "parallel"),
            vmem_limit_bytes=vmem_limit,
        ),
    )


def _choose_mstripe(Mfull, TN):
    # Row stripe per grid step: keep the register-resident f32 partial sum
    # around <=128 KB and give the grid >=2 spatial tiles when cheap.
    if Mfull % 8 != 0:
        return Mfull
    cap = max(8, ((128 * 1024) // (TN * 4)) // 8 * 8)
    best = None
    d = 8
    while d < Mfull:
        if Mfull % d == 0 and d <= cap:
            best = d
        d += 8
    if best is None or (best < 32 and Mfull <= cap):
        return Mfull
    return best


def _build_tap_buffers(x, kh, kw, stride, ph, pw):
    """Stride-phase re-layout (strided convs only): every tap (dy,dx) is a
    contiguous (OH*OW, Cin) row block of one of kw*stride buffers."""
    B, H, W, C = x.shape
    s = stride
    OH = (H + 2 * ph - kh) // s + 1
    OW = (W + 2 * pw - kw) // s + 1
    Phv = (kh - 1) // s + OH
    pad_bot = max(0, s * Phv - (H + 2 * ph))
    xp = jnp.pad(x, ((0, 0), (ph, ph + pad_bot), (pw, pw), (0, 0)))
    bufs = []
    for dx in range(kw):
        for py in range(s):
            sub = xp[:, py::s, dx::s, :][:, :Phv, :OW, :]
            bufs.append(sub.reshape(B, Phv * OW, C))
    return jnp.stack(bufs, axis=1), OH, OW        # (B, kw*s, Phv*OW, C)


def conv3x3_bn_relu(x, w_taps, bias, stride, relu=True):
    """3x3 conv (pad=1) + folded BN + ReLU via the tap-accumulation kernel."""
    B, H, W, Cin = x.shape
    Cout = w_taps.shape[2]
    assert w_taps.shape[1] == Cin
    x = x.astype(jnp.bfloat16)
    if stride == 1:
        # Flat padded layout (~1.1x the activation in HBM instead of 3x):
        # tap (dy,dx) is the contiguous row slab starting at dy*Wp+dx in the
        # flattened padded image.  The kernel computes OH*Wp "wide" rows and
        # the Wp-OW junk columns per row are trimmed after the call.
        OH, OW = H, W
        Wp = W + 2
        xp = jnp.pad(x, ((0, 0), (1, 2), (1, 1), (0, 0)))   # extra bottom row: tap overrun
        buf = xp.reshape(B, (H + 3) * Wp, Cin)
        tap_start = tuple(dy * Wp + dx for dy in range(3) for dx in range(3))
        Mfull = OH * Wp
    else:
        buf4, OH, OW = _build_tap_buffers(x, 3, 3, stride, 1, 1)
        nbuf, L = buf4.shape[1], buf4.shape[2]
        buf = buf4.reshape(B, nbuf * L, Cin)
        tap_start = tuple((dx * stride + dy % stride) * L + (dy // stride) * OW
                          for dy in range(3) for dx in range(3))
        Mfull = OH * OW
    TN = 256 if (Cout > 256 and Cout % 256 == 0) else Cout
    Mstripe = _choose_mstripe(Mfull, TN)
    call = _build_conv3x3(int(B), int(buf.shape[1]), int(Cin), int(Cout),
                          int(TN), int(Mfull), int(Mstripe), tap_start,
                          bool(relu))
    out = call(buf, w_taps, bias)                 # (B, Mfull, Cout)
    if stride == 1:
        return out.reshape(B, OH, Wp, Cout)[:, :, :OW, :]
    return out.reshape(B, OH, OW, Cout)


# ----------------------------------------------------------------------------
# XLA glue (pooling / stem patch extraction)
# ----------------------------------------------------------------------------
def _extract_patches(x, kh, kw, stride, ph, pw):
    # im2col, used only for the 7x7/2 stem where Cin=3 makes the patch matrix
    # tiny (no multi-channel activation blow-up).
    B, H, W, C = x.shape
    xp = jnp.pad(x, ((0, 0), (ph, ph), (pw, pw), (0, 0)))
    OH = (H + 2 * ph - kh) // stride + 1
    OW = (W + 2 * pw - kw) // stride + 1
    cols = []
    for dy in range(kh):
        for dx in range(kw):
            cols.append(xp[:, dy:dy + stride * (OH - 1) + 1:stride,
                              dx:dx + stride * (OW - 1) + 1:stride, :])
    patches = jnp.concatenate(cols, axis=-1)
    return patches.reshape(B * OH * OW, kh * kw * C), (B, OH, OW)


# TODO(synk): 3x3 max pooling stays as XLA reduce_window glue; the conv/matmul
# hot path (and the residual epilogue) are all Pallas.
def max_pool3x3_s2_p1(x):
    init = jnp.asarray(-jnp.inf, dtype=x.dtype)
    return lax.reduce_window(x, init, lax.max, (1, 3, 3, 1), (1, 2, 2, 1),
                             [(0, 0), (1, 1), (1, 1), (0, 0)])


# ----------------------------------------------------------------------------
# Deterministic synthetic parameters (BN scale folded into weights, bf16)
# ----------------------------------------------------------------------------
_BN_EPS = 1e-5
RESNET50_LAYERS = ((64, 3, 1), (128, 4, 2), (256, 6, 2), (512, 3, 2))


class ParamGen:
    def __init__(self, seed=0):
        self.key = jax.random.PRNGKey(seed)
        self.i = 0

    def _next(self):
        self.i += 1
        return jax.random.fold_in(self.key, self.i)

    def conv_weight(self, cout, cin, kh, kw):
        fan_in = cin * kh * kw
        std = (2.0 / fan_in) ** 0.5
        return std * jax.random.normal(self._next(), (cout, cin, kh, kw), jnp.float32)

    def bn(self, c):
        # gamma, beta, running_mean, running_var (eval-mode stats)
        return (jnp.ones((c,), jnp.float32), jnp.zeros((c,), jnp.float32),
                jnp.zeros((c,), jnp.float32), jnp.ones((c,), jnp.float32))

    def linear(self, cin, cout):
        std = (2.0 / cin) ** 0.5      # kaiming_normal_ (fc_init_weights)
        w = std * jax.random.normal(self._next(), (cout, cin), jnp.float32)
        return w, jnp.zeros((cout,), jnp.float32)


def _init_conv1x1(pg, cin, cout):
    cin_p, cout_p = _cpad(cin), _cpad(cout)
    w = pg.conv_weight(cout, cin, 1, 1)[:, :, 0, 0]            # (cout, cin)
    gamma, beta, mean, var = pg.bn(cout)
    scale = gamma / jnp.sqrt(var + _BN_EPS)
    w = (w * scale[:, None]).T                                 # BN scale folded
    b = beta - mean * scale
    wp = jnp.zeros((cin_p, cout_p), jnp.float32).at[:cin, :cout].set(w)
    bp = jnp.zeros((1, cout_p), jnp.float32).at[0, :cout].set(b)
    return {"w": wp.astype(jnp.bfloat16), "b": bp}


def _init_conv3x3(pg, cin, cout):
    cin_p, cout_p = _cpad(cin), _cpad(cout)
    w = pg.conv_weight(cout, cin, 3, 3)
    gamma, beta, mean, var = pg.bn(cout)
    scale = gamma / jnp.sqrt(var + _BN_EPS)
    w = w * scale[:, None, None, None]
    w = jnp.transpose(w, (2, 3, 1, 0)).reshape(9, cin, cout)   # (tap, cin, cout)
    b = beta - mean * scale
    wp = jnp.zeros((9, cin_p, cout_p), jnp.float32).at[:, :cin, :cout].set(w)
    bp = jnp.zeros((1, cout_p), jnp.float32).at[0, :cout].set(b)
    return {"w": wp.astype(jnp.bfloat16), "b": bp}


def _init_stem(pg, cin, cout, k=7):
    cout_p = _cpad(cout)
    Kp = _round_up(k * k * cin, 128)          # 147 -> 256: lane-dense A tile
    w = pg.conv_weight(cout, cin, k, k)
    gamma, beta, mean, var = pg.bn(cout)
    scale = gamma / jnp.sqrt(var + _BN_EPS)
    w = w * scale[:, None, None, None]
    w = jnp.transpose(w, (2, 3, 1, 0)).reshape(k * k * cin, cout)
    b = beta - mean * scale
    wp = jnp.zeros((Kp, cout_p), jnp.float32).at[:k * k * cin, :cout].set(w)
    bp = jnp.zeros((1, cout_p), jnp.float32).at[0, :cout].set(b)
    return {"w": wp.astype(jnp.bfloat16), "b": bp}


def _init_bottleneck(pg, inplanes, planes, downsample):
    p = {"conv1": _init_conv1x1(pg, inplanes, planes),
         "conv2": _init_conv3x3(pg, planes, planes),
         "conv3": _init_conv1x1(pg, planes, planes * 4)}
    if downsample:
        p["down"] = _init_conv1x1(pg, inplanes, planes * 4)
    return p


def init_resnet50_params(dim=128, seed=0):
    pg = ParamGen(seed)
    params = {"stem": _init_stem(pg, 3, 64, 7)}
    layers = []
    inplanes = 64
    for planes, blocks, _stride in RESNET50_LAYERS:
        blks = [_init_bottleneck(pg, inplanes, planes, downsample=True)]
        inplanes = planes * 4
        for _ in range(blocks - 1):
            blks.append(_init_bottleneck(pg, inplanes, planes, downsample=False))
        layers.append(blks)
    params["layers"] = layers
    w, b = pg.linear(2048, dim)                   # torch Linear: y = x @ W.T + b
    params["fc"] = {"w": jnp.transpose(w).astype(jnp.bfloat16),
                    "b": b.reshape(1, dim)}
    return params


# ----------------------------------------------------------------------------
# forward pass
# ----------------------------------------------------------------------------
def _conv1x1_apply(p, x, stride=1, residual=None, relu=True):
    if stride > 1:
        x = x[:, ::stride, ::stride, :]        # 1x1/stride-s conv == subsample + matmul
    B, H, W, C = x.shape
    a = x.reshape(B * H * W, C)
    N = p["w"].shape[1]
    r = residual.reshape(B * H * W, N) if residual is not None else None
    out = matmul_fused(a, p["w"], p["b"], residual=r, relu=relu)
    return out.reshape(B, H, W, N)


def _bottleneck_apply(p, x, stride):
    if "down" in p:
        identity = _conv1x1_apply(p["down"], x, stride=stride, relu=False)
    else:
        identity = x
    out = _conv1x1_apply(p["conv1"], x, relu=True)
    out = conv3x3_bn_relu(out, p["conv2"]["w"], p["conv2"]["b"], stride, relu=True)
    # 1x1 conv + BN + residual add + ReLU fused in one Pallas matmul kernel
    out = _conv1x1_apply(p["conv3"], out, residual=identity, relu=True)
    return out


def _stem_apply(p, x):
    patches, (B, OH, OW) = _extract_patches(x, 7, 7, 2, 3, 3)
    Kp = p["w"].shape[0]
    if patches.shape[1] != Kp:                 # zero-pad K=147 -> 256 (lane-dense)
        patches = jnp.pad(patches, ((0, 0), (0, Kp - patches.shape[1])))
    out = matmul_fused(patches, p["w"], p["b"], relu=True)
    return out.reshape(B, OH, OW, p["w"].shape[1])


def resnet50_embed(params, x_nchw):
    x = jnp.transpose(x_nchw, (0, 2, 3, 1)).astype(jnp.bfloat16)   # NCHW -> NHWC
    x = _stem_apply(params["stem"], x)
    x = max_pool3x3_s2_p1(x)
    for (_planes, _blocks, layer_stride), blk_params in zip(RESNET50_LAYERS,
                                                            params["layers"]):
        for bi, bp in enumerate(blk_params):
            x = _bottleneck_apply(bp, x, layer_stride if bi == 0 else 1)
    feats = jnp.mean(x.astype(jnp.float32), axis=(1, 2))   # avgpool + flatten -> (B, 2048)
    return matmul_fused(feats, params["fc"]["w"], params["fc"]["b"],
                        relu=False, out_dtype=jnp.float32)


def _siamese_forward(params, x1_nchw, x2_nchw):
    # Weight-shared branches -> fuse them into one batch so every matmul/conv
    # tile sees 2x the rows (one dispatch, better MXU / megacore occupancy).
    n = x1_nchw.shape[0]
    x = jnp.concatenate([x1_nchw, x2_nchw], axis=0)
    e = resnet50_embed(params, x)
    return e[:n], e[n:]


class SiameseResNet50:
    """Weight-shared ResNet50 encoder + FC(2048 -> dim); forward(x1, x2) -> (e1, e2)."""

    def __init__(self, dim=128, seed=0):
        self.dim = dim
        self.params = init_resnet50_params(dim=dim, seed=seed)
        self._forward = jax.jit(_siamese_forward)

    def __call__(self, x1_nchw, x2_nchw):
        return self._forward(self.params, x1_nchw, x2_nchw)


# ----------------------------------------------------------------------------
# kernel self-tests against XLA references
# ----------------------------------------------------------------------------
def _self_test_matmul():
    k1, k2, k3, k4 = jax.random.split(jax.random.PRNGKey(7), 4)
    M, K, N = 200, 256, 128               # exercises the ragged-M (pad to 208) path
    a = (0.5 * jax.random.normal(k1, (M, K), jnp.float32)).astype(jnp.bfloat16)
    w = (0.05 * jax.random.normal(k2, (K, N), jnp.float32)).astype(jnp.bfloat16)
    b = 0.1 * jax.random.normal(k3, (1, N), jnp.float32)
    r = (0.5 * jax.random.normal(k4, (M, N), jnp.float32)).astype(jnp.bfloat16)
    got = matmul_fused(a, w, b, residual=r, relu=True, out_dtype=jnp.float32)
    ref = jnp.maximum(a.astype(jnp.float32) @ w.astype(jnp.float32)
                      + b + r.astype(jnp.float32), 0.0)
    err = float(jnp.max(jnp.abs(got - ref)))
    assert err < 5e-2, f"matmul max err {err}"


def _self_test_conv3x3():
    k1, k2, k3 = jax.random.split(jax.random.PRNGKey(42), 3)
    B, H, W, Cin, Cout = 2, 16, 16, 128, 128
    x = (0.5 * jax.random.normal(k1, (B, H, W, Cin), jnp.float32)).astype(jnp.bfloat16)
    w = (0.05 * jax.random.normal(k2, (9, Cin, Cout), jnp.float32)).astype(jnp.bfloat16)
    b = 0.1 * jax.random.normal(k3, (1, Cout), jnp.float32)
    for stride in (1, 2):
        got = conv3x3_bn_relu(x, w, b, stride, relu=True).astype(jnp.float32)
        ref = lax.conv_general_dilated(
            x.astype(jnp.float32),
            w.astype(jnp.float32).reshape(3, 3, Cin, Cout),
            (stride, stride), [(1, 1), (1, 1)],
            dimension_numbers=("NHWC", "HWIO", "NHWC"))
        ref = jnp.maximum(ref + b.reshape(1, 1, 1, Cout), 0.0)
        err = float(jnp.max(jnp.abs(got - ref)))
        assert err < 5e-2, f"conv3x3 stride={stride} max err {err}"


# ----------------------------------------------------------------------------
if __name__ == "__main__":
    # unit checks of the two Pallas kernels
    _self_test_matmul()
    _self_test_conv3x3()

    key = jax.random.PRNGKey(0)
    B, C, H, W = 2, 3, 64, 64      # small input; survives the 5 stride-2 stages
    dim = 128
    k1, k2 = jax.random.split(key)
    x1 = jax.random.normal(k1, (B, C, H, W), jnp.float32)
    x2 = jax.random.normal(k2, (B, C, H, W), jnp.float32)

    model = SiameseResNet50(dim=dim, seed=0)
    e1, e2 = model(x1, x2)
    jax.block_until_ready((e1, e2))

    assert e1.shape == (B, dim) and e2.shape == (B, dim)
    assert bool(jnp.all(jnp.isfinite(e1))) and bool(jnp.all(jnp.isfinite(e2)))
    # shared weights: identical inputs must give identical embeddings
    e1b, _ = model(x1, x1)
    assert bool(jnp.allclose(e1, e1b, atol=1e-5, rtol=1e-5))
    print("KERNEL_OK")
</pallas_src>

<mosaic_0001>
module attributes {stable_mosaic.version = 11 : i64} {
  func.func @_mm_res_kernel(%arg0: i32, %arg1: i32, %arg2: memref<208x256xbf16, #tpu.memory_space<vmem>>, %arg3: memref<256x128xbf16, #tpu.memory_space<vmem>>, %arg4: memref<1x128xf32, #tpu.memory_space<vmem>>, %arg5: memref<208x128xbf16, #tpu.memory_space<vmem>>, %arg6: memref<208x128xf32, #tpu.memory_space<vmem>>) attributes {dimension_semantics = [#tpu.dimension_semantics<parallel>, #tpu.dimension_semantics<parallel>], iteration_bounds = array<i64: 1, 1>, scalar_prefetch = 0 : i64, scratch_operands = 0 : i64, tpu.core_type = #tpu.core_type<tc>, window_params = [{transform_indices = @transform_0, window_bounds = array<i64: 208, 256>}, {transform_indices = @transform_1, window_bounds = array<i64: 256, 128>}, {transform_indices = @transform_2, window_bounds = array<i64: 1, 128>}, {transform_indices = @transform_3, window_bounds = array<i64: 208, 128>}, {transform_indices = @transform_4, window_bounds = array<i64: 208, 128>}]} {
    %c0 = arith.constant 0 : index
    %c0_0 = arith.constant 0 : index
    %0 = vector.load %arg2[%c0, %c0_0] : memref<208x256xbf16, #tpu.memory_space<vmem>>, vector<208x256xbf16>
    %c0_1 = arith.constant 0 : index
    %c0_2 = arith.constant 0 : index
    %1 = vector.load %arg3[%c0_1, %c0_2] : memref<256x128xbf16, #tpu.memory_space<vmem>>, vector<256x128xbf16>
    %cst = arith.constant dense<0.000000e+00> : vector<208x128xf32>
    %2 = tpu.matmul %0, %1, %cst {dimension_numbers = #tpu.dot_dimension_numbers<[1], [0], [0], [1], [0, 0, 1, 1], [], []>} : vector<208x256xbf16>, vector<256x128xbf16>, vector<208x128xf32> -> vector<208x128xf32>
    %c0_3 = arith.constant 0 : index
    %c0_4 = arith.constant 0 : index
    %3 = vector.load %arg4[%c0_3, %c0_4] : memref<1x128xf32, #tpu.memory_space<vmem>>, vector<1x128xf32>
    %4 = vector.broadcast %3 : vector<1x128xf32> to vector<208x128xf32>
    %5 = arith.addf %2, %4 : vector<208x128xf32>
    %c0_5 = arith.constant 0 : index
    %c0_6 = arith.constant 0 : index
    %6 = vector.load %arg5[%c0_5, %c0_6] : memref<208x128xbf16, #tpu.memory_space<vmem>>, vector<208x128xbf16>
    %7 = arith.extf %6 : vector<208x128xbf16> to vector<208x128xf32>
    %8 = arith.addf %5, %7 : vector<208x128xf32>
    %cst_7 = arith.constant 0.000000e+00 : f32
    %9 = vector.broadcast %cst_7 : f32 to vector<208x128xf32>
    %10 = arith.maximumf %8, %9 : vector<208x128xf32>
    %c0_8 = arith.constant 0 : index
    %c0_9 = arith.constant 0 : index
    %11 = vector.load %arg6[%c0_8, %c0_9] : memref<208x128xf32, #tpu.memory_space<vmem>>, vector<208x128xf32>
    tpu.vector_store %arg6[%c0_8, %c0_9], %10 {strides = array<i32>} : memref<208x128xf32, #tpu.memory_space<vmem>>, vector<208x128xf32>,
    return
  }
  func.func @transform_0(%arg0: i32, %arg1: i32) -> (i32, i32) {
    %c0_i32 = arith.constant 0 : i32
    %c0_i32_0 = arith.constant 0 : i32
    return %arg0, %c0_i32 : i32, i32
  }
  func.func @transform_1(%arg0: i32, %arg1: i32) -> (i32, i32) {
    %c0_i32 = arith.constant 0 : i32
    %c0_i32_0 = arith.constant 0 : i32
    return %c0_i32, %arg1 : i32, i32
  }
  func.func @transform_2(%arg0: i32, %arg1: i32) -> (i32, i32) {
    %c0_i32 = arith.constant 0 : i32
    %c0_i32_0 = arith.constant 0 : i32
    return %c0_i32, %arg1 : i32, i32
  }
  func.func @transform_3(%arg0: i32, %arg1: i32) -> (i32, i32) {
    %c0_i32 = arith.constant 0 : i32
    return %arg0, %arg1 : i32, i32
  }
  func.func @transform_4(%arg0: i32, %arg1: i32) -> (i32, i32) {
    %c0_i32 = arith.constant 0 : i32
    return %arg0, %arg1 : i32, i32
  }
}

</mosaic_0001>

<bundles_post_ra>
// kernel: tpu_custom_call.1
= control target key start
LH: loop header
LB: loop body
LE: loop exit
PB: predicated region body
PF: predicated region fallthrough
CT: control target
= control target key end

     0   :  { %9 = vsyncpa [#allocation3], 0  ;;  %s1140_s0 = inlined_call_operand.hbm [shape: bf16[208,256], index: 0, kind: input, shape index: {}]   ;;  %s1141_s1 = inlined_call_operand.hbm [shape: bf16[256,128], index: 1, kind: input, shape index: {}]   ;;  %s1142_s2 = inlined_call_operand.vmem [shape: f32[1,128], index: 2, kind: input, shape index: {}]   ;;  %s1143_s3 = inlined_call_operand.hbm [shape: bf16[208,128], index: 3, kind: input, shape index: {}]   ;;  %s1144_s4 = inlined_call_operand.hbm [shape: f32[208,128], index: 4, kind: output, shape index: {}]  }
   0x1   :  { %10 = vsyncpa [#allocation6], 0  ;;  %s29_s17 = sshll.u32 %s1141_s1, 4  ;;  %s30_s17 = int_to_ptr.hbm [resolvable:$true] %s29_s17 }
   0x2   :  { %11 = vsyncpa [#allocation4], 0  ;;  %s1052_s18 = smov [#allocation5]   ;;  %s16_s22 = sshll.u32 %s1140_s0, 4  ;;  %s17_s22 = int_to_ptr.hbm [resolvable:$true] %s16_s22 }
   0x3   :  { %s31_s19 = sshll.u32 %s1052_s18, 4  ;;  %s1053_s23 = smov 64   ;;  %s32_s19 = int_to_ptr.vmem [resolvable:$true] %s31_s19 }
   0x4   :  { %s1054_s24 = smov 4   ;;  %s1055_s25 = smov [#allocation2]  }
   0x5   :  { %37 = dma.hbm_to_vmem [thread:$0]  %s30_s17, 2048, %s32_s19, [#allocation6], %s1053_s23, %s1053_s23, %s1054_s24  }
   0x6   :  { %s18_s26 = sshll.u32 %s1055_s25, 4  ;;  %s1056_s27 = smov 128   ;;  %s19_s26 = int_to_ptr.vmem [resolvable:$true] %s18_s26 }
   0x7   :  { %s1057_s28 = smov 8   ;;  %s44_s30 = sshll.u32 %s1143_s3, 4  ;;  %s45_s30 = int_to_ptr.hbm [resolvable:$true] %s44_s30 }
   0x8   :  { %24 = dma.hbm_to_vmem [thread:$0]  %s17_s22, 3328, %s19_s26, [#allocation3], %s1056_s27, %s1056_s27, %s1057_s28  }
   0x9   :  { %s1058_s5 = smov [#allocation7]  }
   0xa   :  { %s46_s0 = sshll.u32 %s1058_s5, 4  ;;  %s47_s0 = int_to_ptr.vmem [resolvable:$true] %s46_s0 }
   0xb   :  { %52 = dma.hbm_to_vmem [thread:$0]  %s45_s30, 1664, %s47_s0, [#allocation6], %s1053_s23, %s1053_s23, %s1054_s24  }
   0xc   :  { %1046 = dma.done.wait [#allocation3], 3328  }
   0xd   :  { %1047 = vsyncadd [#allocation3], 4294963968 }
   0xe   :  { %1048 = dma.done.wait [#allocation6], 3712  }
   0xf   :  { %1049 = vsyncadd [#allocation6], 4294963584  ;;  %v852_v0 = vld [vmem:[#allocation5 + $0x38] sm:$0xff]  ;;  %v851_v2 = vld [vmem:[#allocation5 + $0x30] sm:$0xff]  ;;  %s637_s10 = sshll.u32 %s1144_s4, 4  ;;  %s638_s10 = int_to_ptr.hbm [resolvable:$true] %s637_s10 }
  0x10   :  { %v860_v1 = vld [vmem:[#allocation5 + $0x78] sm:$0xff]  ;;  %353 = vmatpush.bf16.msra.mxu0 %v852_v0  ;;  %925 = vmatpush.bf16.msra.mxu2 %v852_v0  ;;  %v859_v3 = vld [vmem:[#allocation5 + $0x70] sm:$0xff]  ;;  %v850_v4 = vld [vmem:[#allocation5 + $0x28] sm:$0xff] }
  0x11   :  { %427 = vmatpush.bf16.msra.mxu1 %v860_v1  ;;  %933 = vmatpush.bf16.msra.mxu3 %v860_v1  ;;  %v858_v5 = vld [vmem:[#allocation5 + $0x68] sm:$0xff]  ;;  %v849_v6 = vld [vmem:[#allocation5 + $0x20] sm:$0xff]  ;;  %v848_v8 = vld [vmem:[#allocation5 + $0x18] sm:$0xff] }
  0x12   :  { %v857_v7 = vld [vmem:[#allocation5 + $0x60] sm:$0xff]  ;;  %v856_v9 = vld [vmem:[#allocation5 + $0x58] sm:$0xff]  ;;  %v847_v10 = vld [vmem:[#allocation5 + $0x10] sm:$0xff] }
  0x13   :  { %v855_v11 = vld [vmem:[#allocation5 + $0x50] sm:$0xff]  ;;  %v846_v12 = vld [vmem:[#allocation5 + $0x8] sm:$0xff]  ;;  %v845_v14 = vld [vmem:[#allocation5] sm:$0xff] }
  0x14   :  { %354 = vmatpush.bf16.msra.mxu0 %v851_v2  ;;  %926 = vmatpush.bf16.msra.mxu2 %v851_v2  ;;  %v854_v13 = vld [vmem:[#allocation5 + $0x48] sm:$0xff]  ;;  %v853_v15 = vld [vmem:[#allocation5 + $0x40] sm:$0xff]  ;;  %v653_v16 = vld [vmem:[#allocation2] sm:$0xf] }
  0x15   :  { %428 = vmatpush.bf16.msra.mxu1 %v859_v3  ;;  %934 = vmatpush.bf16.msra.mxu3 %v859_v3  ;;  %v820_v17 = vld [vmem:[#allocation2 + $0x4] sm:$0xf0]  ;;  %v701_v18 = vld [vmem:[#allocation2 + $0x60] sm:$0xf]  ;;  %v819_v20 = vld [vmem:[#allocation2 + $0x4] sm:$0xf] }
  0x16   :  { %v832_v19 = vld [vmem:[#allocation2 + $0x64] sm:$0xf0]  ;;  %v655_v21 = vld [vmem:[#allocation2 + $0x8] sm:$0xf0]  ;;  %v833_v22 = vld [vmem:[#allocation2 + $0x74] sm:$0xf]  ;;  %v654_v24 = vor.u32 %v820_v17, %v653_v16 }
  0x17   :  { %v711_v23 = vld [vmem:[#allocation2 + $0x78] sm:$0xf0]  ;;  %v702_v25 = vor.u32 %v832_v19, %v701_v18  ;;  %v658_v26 = vor.u32 %v819_v20, %v655_v21  ;;  %v661_v28 = vld [vmem:[#allocation2 + $0x10] sm:$0xf]  ;;  %v822_v29 = vld [vmem:[#allocation2 + $0x14] sm:$0xf0] }
  0x18   :  { %355 = vmatpush.bf16.msra.mxu0 %v850_v4  ;;  %927 = vmatpush.bf16.msra.mxu2 %v850_v4  ;;  %v714_v27 = vor.u32 %v833_v22, %v711_v23  ;;  %v709_v30 = vld [vmem:[#allocation2 + $0x70] sm:$0xf]  ;;  %v834_v31 = vld [vmem:[#allocation2 + $0x74] sm:$0xf0]  ;;  %v821_v32 = vld [vmem:[#allocation2 + $0x14] sm:$0xf]  ;;  %v662_v36 = vor.u32 %v822_v29, %v661_v28 }
  0x19   :  { %429 = vmatpush.bf16.msra.mxu1 %v858_v5  ;;  %935 = vmatpush.bf16.msra.mxu3 %v858_v5  ;;  %v663_v33 = vld [vmem:[#allocation2 + $0x18] sm:$0xf0]  ;;  %v835_v34 = vld [vmem:[#allocation2 + $0x84] sm:$0xf]  ;;  %v719_v35 = vld [vmem:[#allocation2 + $0x88] sm:$0xf0]  ;;  %v710_v37 = vor.u32 %v834_v31, %v709_v30 }
  0x1a   :  { %v666_v38 = vor.u32 %v821_v32, %v663_v33  ;;  %v722_v39 = vor.u32 %v835_v34, %v719_v35  ;;  %v669_v40 = vld [vmem:[#allocation2 + $0x20] sm:$0xf]  ;;  %v824_v41 = vld [vmem:[#allocation2 + $0x24] sm:$0xf0]  ;;  %v823_v44 = vld [vmem:[#allocation2 + $0x24] sm:$0xf] }
  0x1b   :  { %v717_v42 = vld [vmem:[#allocation2 + $0x80] sm:$0xf]  ;;  %v836_v43 = vld [vmem:[#allocation2 + $0x84] sm:$0xf0]  ;;  %v671_v45 = vld [vmem:[#allocation2 + $0x28] sm:$0xf0]  ;;  %v670_v48 = vor.u32 %v824_v41, %v669_v40 }
  0x1c   :  { %356 = vmatpush.bf16.msra.mxu0 %v849_v6  ;;  %928 = vmatpush.bf16.msra.mxu2 %v849_v6  ;;  %v837_v46 = vld [vmem:[#allocation2 + $0x94] sm:$0xf]  ;;  %v727_v47 = vld [vmem:[#allocation2 + $0x98] sm:$0xf0]  ;;  %v718_v49 = vor.u32 %v836_v43, %v717_v42  ;;  %v674_v50 = vor.u32 %v823_v44, %v671_v45  ;;  %v677_v52 = vld [vmem:[#allocation2 + $0x30] sm:$0xf] }
  0x1d   :  { %430 = vmatpush.bf16.msra.mxu1 %v857_v7  ;;  %936 = vmatpush.bf16.msra.mxu3 %v857_v7  ;;  %v730_v51 = vor.u32 %v837_v46, %v727_v47  ;;  %v826_v53 = vld [vmem:[#allocation2 + $0x34] sm:$0xf0]  ;;  %v725_v54 = vld [vmem:[#allocation2 + $0x90] sm:$0xf]  ;;  %v825_v56 = vld [vmem:[#allocation2 + $0x34] sm:$0xf] }
  0x1e   :  { %v838_v55 = vld [vmem:[#allocation2 + $0x94] sm:$0xf0]  ;;  %v679_v57 = vld [vmem:[#allocation2 + $0x38] sm:$0xf0]  ;;  %v839_v58 = vld [vmem:[#allocation2 + $0xa4] sm:$0xf]  ;;  %v678_v60 = vor.u32 %v826_v53, %v677_v52 }
  0x1f   :  { %v735_v59 = vld [vmem:[#allocation2 + $0xa8] sm:$0xf0]  ;;  %v726_v61 = vor.u32 %v838_v55, %v725_v54  ;;  %v682_v62 = vor.u32 %v825_v56, %v679_v57  ;;  %v685_v0 = vld [vmem:[#allocation2 + $0x40] sm:$0xf]  ;;  %v828_v1 = vld [vmem:[#allocation2 + $0x44] sm:$0xf0] }
  0x20   :  { %357 = vmatpush.bf16.msra.mxu0 %v848_v8  ;;  %929 = vmatpush.bf16.msra.mxu2 %v848_v8  ;;  %v738_v63 = vor.u32 %v839_v58, %v735_v59  ;;  %v733_v2 = vld [vmem:[#allocation2 + $0xa0] sm:$0xf]  ;;  %v840_v3 = vld [vmem:[#allocation2 + $0xa4] sm:$0xf0]  ;;  %v827_v4 = vld [vmem:[#allocation2 + $0x44] sm:$0xf]  ;;  %v686_v8 = vor.u32 %v828_v1, %v685_v0 }
  0x21   :  { %431 = vmatpush.bf16.msra.mxu1 %v856_v9  ;;  %937 = vmatpush.bf16.msra.mxu3 %v856_v9  ;;  %v687_v5 = vld [vmem:[#allocation2 + $0x48] sm:$0xf0]  ;;  %v841_v6 = vld [vmem:[#allocation2 + $0xb4] sm:$0xf]  ;;  %v743_v7 = vld [vmem:[#allocation2 + $0xb8] sm:$0xf0]  ;;  %v734_v9 = vor.u32 %v840_v3, %v733_v2 }
  0x22   :  { %v829_v16 = vld [vmem:[#allocation2 + $0x54] sm:$0xf]  ;;  %v695_v17 = vld [vmem:[#allocation2 + $0x58] sm:$0xf0]  ;;  %v843_v18 = vld [vmem:[#allocation2 + $0xc4] sm:$0xf] }
  0x23   :  { %v751_v19 = vld [vmem:[#allocation2 + $0xc8] sm:$0xf0]  ;;  %v698_v22 = vor.u32 %v829_v16, %v695_v17  ;;  %v1100_v30 = vld [vmem:[%s1142_s2] ss:$0 sm:$0xff]  ;;  %v862_v31 = vld [vmem:[#allocation7] sm:$0xff]   ;;  %s1059_s2 = smov [#allocation8]  }
  0x24   :  { %358 = vmatpush.bf16.msra.mxu0 %v847_v10  ;;  %930 = vmatpush.bf16.msra.mxu2 %v847_v10  ;;  %v690_v10 = vor.u32 %v827_v4, %v687_v5  ;;  %v754_v23 = vor.u32 %v843_v18, %v751_v19  ;;  %v863_v35 = vunpack.c.l.bf16 %v862_v31  ;;  %v864_v44 = vunpack.c.h.bf16 %v862_v31  ;;  %v919_v56 = vld [vmem:[#allocation7 + $0x38] sm:$0xff]   ;;  %s635_s7 = sshll.u32 %s1059_s2, 4  ;;  %s636_s7 = int_to_ptr.vmem [resolvable:$true] %s635_s7 }
  0x25   :  { %432 = vmatpush.bf16.msra.mxu1 %v855_v11  ;;  %938 = vmatpush.bf16.msra.mxu3 %v855_v11  ;;  %v746_v11 = vor.u32 %v841_v6, %v743_v7 }
  0x28   :  { %359 = vmatpush.bf16.msra.mxu0 %v846_v12  ;;  %931 = vmatpush.bf16.msra.mxu2 %v846_v12  ;;  %v693_v12 = vld [vmem:[#allocation2 + $0x50] sm:$0xf] }
  0x29   :  { %433 = vmatpush.bf16.msra.mxu1 %v854_v13  ;;  %939 = vmatpush.bf16.msra.mxu3 %v854_v13  ;;  %v830_v13 = vld [vmem:[#allocation2 + $0x54] sm:$0xf0] }
  0x2a   :  { %v694_v20 = vor.u32 %v830_v13, %v693_v12  ;;  %v892_v12 = vunpack.c.h.bf16 %v919_v56 }
  0x2c   :  { %360 = vmatpush.bf16.msra.mxu0 %v845_v14  ;;  %932 = vmatpush.bf16.msra.mxu2 %v845_v14  ;;  %v741_v14 = vld [vmem:[#allocation2 + $0xb0] sm:$0xf] }
  0x2d   :  { %434 = vmatpush.bf16.msra.mxu1 %v853_v15  ;;  %940 = vmatpush.bf16.msra.mxu3 %v853_v15  ;;  %v842_v15 = vld [vmem:[#allocation2 + $0xb4] sm:$0xf0] }
  0x2e   :  { %v742_v21 = vor.u32 %v842_v15, %v741_v14 }
  0x2f   :  { %361 = vmatmul.bf16.vlgmr.msra.gmra.mxu0 %v654_v24  ;;  %391 = vmatmul.bf16.vlgmr.msra.gmra.mxu2 %v702_v25  ;;  %v749_v24 = vld [vmem:[#allocation2 + $0xc0] sm:$0xf]  ;;  %v844_v25 = vld [vmem:[#allocation2 + $0xc4] sm:$0xf0] }
  0x30   :  { %435 = vmatmul.bf16.vlgmr.msra.gmra.mxu1 %v658_v26  ;;  %470 = vmatmul.bf16.vlgmr.msra.gmra.mxu3 %v714_v27  ;;  %v831_v26 = vld [vmem:[#allocation2 + $0x64] sm:$0xf]  ;;  %v703_v27 = vld [vmem:[#allocation2 + $0x68] sm:$0xf0]  ;;  %v750_v28 = vor.u32 %v844_v25, %v749_v24 }
  0x31   :  { %v706_v29 = vor.u32 %v831_v26, %v703_v27 }
  0x3f   :  { %366 = vmatmul.bf16.gmra.mxu0 %v662_v36  ;;  %396 = vmatmul.bf16.gmra.mxu2 %v710_v37 }
  0x40   :  { %440 = vmatmul.bf16.gmra.mxu1 %v666_v38  ;;  %475 = vmatmul.bf16.gmra.mxu3 %v722_v39 }
  0x4f   :  { %371 = vmatmul.bf16.gmra.mxu0 %v670_v48  ;;  %401 = vmatmul.bf16.gmra.mxu2 %v718_v49  ;;  %v913_v48 = vld [vmem:[#allocation7 + $0x8] sm:$0xff]  }
  0x50   :  { %445 = vmatmul.bf16.gmra.mxu1 %v674_v50  ;;  %480 = vmatmul.bf16.gmra.mxu3 %v730_v51  ;;  %v867_v54 = vunpack.c.l.bf16 %v913_v48  ;;  %v868_v3 = vunpack.c.h.bf16 %v913_v48 }
  0x5f   :  { %376 = vmatmul.bf16.gmra.mxu0 %v678_v60  ;;  %406 = vmatmul.bf16.gmra.mxu2 %v726_v61  ;;  %v891_v61 = vunpack.c.l.bf16 %v919_v56 }
  0x60   :  { %450 = vmatmul.bf16.gmra.mxu1 %v682_v62  ;;  %485 = vmatmul.bf16.gmra.mxu3 %v738_v63 }
  0x6f   :  { %381 = vmatmul.bf16.gmra.mxu0 %v686_v8  ;;  %411 = vmatmul.bf16.gmra.mxu2 %v734_v9  ;;  %v914_v9 = vld [vmem:[#allocation7 + $0x10] sm:$0xff]  }
  0x70   :  { %455 = vmatmul.bf16.gmra.mxu1 %v690_v10  ;;  %490 = vmatmul.bf16.gmra.mxu3 %v746_v11  ;;  %v871_v18 = vunpack.c.l.bf16 %v914_v9 }
  0x7f   :  { %386 = vmatmul.bf16.gmra.mxu0 %v694_v20  ;;  %416 = vmatmul.bf16.gmra.mxu2 %v742_v21  ;;  %v920_v21 = vld [vmem:[#allocation7 + $0x40] sm:$0xff]  }
  0x80   :  { %460 = vmatmul.bf16.gmra.mxu1 %v698_v22  ;;  %495 = vmatmul.bf16.gmra.mxu3 %v754_v23  ;;  %v895_v27 = vunpack.c.l.bf16 %v920_v21 }
  0x8f   :  { %421 = vmatmul.bf16.gmra.mxu2 %v750_v28 }
  0x90   :  { %465 = vmatmul.bf16.gmra.mxu1 %v706_v29 }
  0xac   :  { %v362_v32 = vpop.f32.mrf.mxu0 }
  0xad   :  { %v363_v33 = vadd.f32 %v1100_v30, %v362_v32  ;;  %v436_v34 = vpop.f32.mrf.mxu1 }
  0xaf   :  { %v437_v36 = vadd.f32 %v436_v34, %v363_v33  ;;  %v872_v33 = vunpack.c.h.bf16 %v914_v9 }
  0xb1   :  { %v553_v37 = vadd.f32 %v863_v35, %v437_v36 }
  0xb2   :  { %v1103_v38 = vpop.f32.mrf.mxu2 }
  0xb3   :  { %v579_v39 = vmax.f32 %v553_v37, 0.0  ;;  %v471_v40 = vpop.f32.mrf.mxu3 }
  0xb4   :  { %v364_v41 = vpop.f32.mrf.mxu0 }
  0xb5   :  { %605 = vst [vmem:[#allocation8] sm:$0xff] %v579_v39  ;;  %v365_v42 = vadd.f32 %v1100_v30, %v364_v41  ;;  %v438_v43 = vpop.f32.mrf.mxu1  ;;  %v915_v41 = vld [vmem:[#allocation7 + $0x18] sm:$0xff]  }
  0xb7   :  { %v439_v45 = vadd.f32 %v438_v43, %v365_v42 }
  0xb9   :  { %v554_v46 = vadd.f32 %v864_v44, %v439_v45  ;;  %v896_v44 = vunpack.c.h.bf16 %v920_v21 }
  0xba   :  { %v1106_v47 = vpop.f32.mrf.mxu2 }
  0xbb   :  { %v580_v49 = vmax.f32 %v554_v46, 0.0  ;;  %v473_v50 = vpop.f32.mrf.mxu3 }
  0xbc   :  { %v367_v51 = vpop.f32.mrf.mxu0 }
  0xbd   :  { %606 = vst [vmem:[#allocation8 + $0x8] sm:$0xff] %v580_v49  ;;  %v368_v52 = vadd.f32 %v1100_v30, %v367_v51  ;;  %v441_v53 = vpop.f32.mrf.mxu1 }
  0xbf   :  { %v442_v55 = vadd.f32 %v441_v53, %v368_v52  ;;  %v921_v53 = vld [vmem:[#allocation7 + $0x48] sm:$0xff]  }
  0xc1   :  { %v555_v57 = vadd.f32 %v867_v54, %v442_v55 }
  0xc2   :  { %v397_v58 = vpop.f32.mrf.mxu2 }
  0xc3   :  { %v581_v59 = vmax.f32 %v555_v57, 0.0  ;;  %v398_v60 = vadd.f32 %v1100_v30, %v397_v58  ;;  %v476_v62 = vpop.f32.mrf.mxu3 }
  0xc4   :  { %v369_v63 = vpop.f32.mrf.mxu0 }
  0xc5   :  { %607 = vst [vmem:[#allocation8 + $0x10] sm:$0xff] %v581_v59  ;;  %v472_v0 = vadd.f32 %v471_v40, %v398_v60  ;;  %v370_v1 = vadd.f32 %v1100_v30, %v369_v63  ;;  %v443_v2 = vpop.f32.mrf.mxu1  ;;  %v899_v60 = vunpack.c.l.bf16 %v921_v53 }
  0xc7   :  { %v567_v4 = vadd.f32 %v891_v61, %v472_v0  ;;  %v444_v5 = vadd.f32 %v443_v2, %v370_v1  ;;  %v876_v1 = vunpack.c.h.bf16 %v915_v41 }
  0xc9   :  { %v593_v6 = vmax.f32 %v567_v4, 0.0  ;;  %v556_v7 = vadd.f32 %v868_v3, %v444_v5 }
  0xca   :  { %v399_v8 = vpop.f32.mrf.mxu2 }
  0xcb   :  { %619 = vst [vmem:[#allocation8 + $0x70] sm:$0xff] %v593_v6  ;;  %v582_v10 = vmax.f32 %v556_v7, 0.0  ;;  %v400_v11 = vadd.f32 %v1100_v30, %v399_v8  ;;  %v478_v14 = vpop.f32.mrf.mxu3  ;;  %v916_v7 = vld [vmem:[#allocation7 + $0x20] sm:$0xff]  }
  0xcc   :  { %v372_v13 = vpop.f32.mrf.mxu0 }
  0xcd   :  { %608 = vst [vmem:[#allocation8 + $0x18] sm:$0xff] %v582_v10  ;;  %v474_v15 = vadd.f32 %v473_v50, %v400_v11  ;;  %v373_v16 = vadd.f32 %v1100_v30, %v372_v13  ;;  %v446_v17 = vpop.f32.mrf.mxu1  ;;  %v875_v50 = vunpack.c.l.bf16 %v915_v41  ;;  %v900_v11 = vunpack.c.h.bf16 %v921_v53 }
  0xcf   :  { %v568_v19 = vadd.f32 %v892_v12, %v474_v15  ;;  %v447_v20 = vadd.f32 %v446_v17, %v373_v16  ;;  %v879_v16 = vunpack.c.l.bf16 %v916_v7 }
  0xd1   :  { %v594_v22 = vmax.f32 %v568_v19, 0.0  ;;  %v557_v23 = vadd.f32 %v871_v18, %v447_v20  ;;  %v922_v19 = vld [vmem:[#allocation7 + $0x50] sm:$0xff]  }
  0xd2   :  { %v402_v24 = vpop.f32.mrf.mxu2 }
  0xd3   :  { %620 = vst [vmem:[#allocation8 + $0x78] sm:$0xff] %v594_v22  ;;  %v583_v25 = vmax.f32 %v557_v23, 0.0  ;;  %v403_v26 = vadd.f32 %v1100_v30, %v402_v24  ;;  %v481_v34 = vpop.f32.mrf.mxu3 }
  0xd4   :  { %v374_v28 = vpop.f32.mrf.mxu0 }
  0xd5   :  { %609 = vst [vmem:[#allocation8 + $0x20] sm:$0xff] %v583_v25  ;;  %v477_v29 = vadd.f32 %v476_v62, %v403_v26  ;;  %v375_v31 = vadd.f32 %v1100_v30, %v374_v28  ;;  %v448_v32 = vpop.f32.mrf.mxu1  ;;  %v903_v25 = vunpack.c.l.bf16 %v922_v19 }
  0xd7   :  { %v569_v35 = vadd.f32 %v895_v27, %v477_v29  ;;  %v449_v36 = vadd.f32 %v448_v32, %v375_v31  ;;  %v880_v32 = vunpack.c.h.bf16 %v916_v7 }
  0xd9   :  { %v595_v37 = vmax.f32 %v569_v35, 0.0  ;;  %v558_v39 = vadd.f32 %v872_v33, %v449_v36 }
  0xda   :  { %v404_v40 = vpop.f32.mrf.mxu2 }
  0xdb   :  { %621 = vst [vmem:[#allocation8 + $0x80] sm:$0xff] %v595_v37  ;;  %v584_v42 = vmax.f32 %v558_v39, 0.0  ;;  %v405_v43 = vadd.f32 %v1100_v30, %v404_v40  ;;  %v483_v54 = vpop.f32.mrf.mxu3  ;;  %v917_v39 = vld [vmem:[#allocation7 + $0x28] sm:$0xff]  }
  0xdc   :  { %v377_v45 = vpop.f32.mrf.mxu0 }
  0xdd   :  { %610 = vst [vmem:[#allocation8 + $0x28] sm:$0xff] %v584_v42  ;;  %v479_v46 = vadd.f32 %v478_v14, %v405_v43  ;;  %v378_v48 = vadd.f32 %v1100_v30, %v377_v45  ;;  %v451_v49 = vpop.f32.mrf.mxu1  ;;  %v904_v42 = vunpack.c.h.bf16 %v922_v19 }
  0xdf   :  { %v570_v51 = vadd.f32 %v896_v44, %v479_v46  ;;  %v452_v52 = vadd.f32 %v451_v49, %v378_v48  ;;  %v883_v48 = vunpack.c.l.bf16 %v917_v39 }
  0xe1   :  { %v596_v55 = vmax.f32 %v570_v51, 0.0  ;;  %v559_v56 = vadd.f32 %v875_v50, %v452_v52  ;;  %v923_v52 = vld [vmem:[#allocation7 + $0x58] sm:$0xff]  }
  0xe2   :  { %v407_v57 = vpop.f32.mrf.mxu2 }
  0xe3   :  { %622 = vst [vmem:[#allocation8 + $0x88] sm:$0xff] %v596_v55  ;;  %v585_v58 = vmax.f32 %v559_v56, 0.0  ;;  %v408_v59 = vadd.f32 %v1100_v30, %v407_v57  ;;  %v486_v8 = vpop.f32.mrf.mxu3 }
  0xe4   :  { %v379_v61 = vpop.f32.mrf.mxu0 }
  0xe5   :  { %611 = vst [vmem:[#allocation8 + $0x30] sm:$0xff] %v585_v58  ;;  %v482_v62 = vadd.f32 %v481_v34, %v408_v59  ;;  %v380_v63 = vadd.f32 %v1100_v30, %v379_v61  ;;  %v453_v0 = vpop.f32.mrf.mxu1  ;;  %v907_v58 = vunpack.c.l.bf16 %v923_v52 }
  0xe7   :  { %v571_v2 = vadd.f32 %v899_v60, %v482_v62  ;;  %v454_v3 = vadd.f32 %v453_v0, %v380_v63  ;;  %v884_v63 = vunpack.c.h.bf16 %v917_v39 }
  0xe9   :  { %v597_v4 = vmax.f32 %v571_v2, 0.0  ;;  %v560_v5 = vadd.f32 %v876_v1, %v454_v3 }
  0xea   :  { %v409_v6 = vpop.f32.mrf.mxu2 }
  0xeb   :  { %623 = vst [vmem:[#allocation8 + $0x90] sm:$0xff] %v597_v4  ;;  %v586_v9 = vmax.f32 %v560_v5, 0.0  ;;  %v410_v10 = vadd.f32 %v1100_v30, %v409_v6  ;;  %v488_v27 = vpop.f32.mrf.mxu3  ;;  %v918_v5 = vld [vmem:[#allocation7 + $0x30] sm:$0xff]  }
  0xec   :  { %v382_v12 = vpop.f32.mrf.mxu0 }
  0xed   :  { %612 = vst [vmem:[#allocation8 + $0x38] sm:$0xff] %v586_v9  ;;  %v484_v13 = vadd.f32 %v483_v54, %v410_v10  ;;  %v383_v14 = vadd.f32 %v1100_v30, %v382_v12  ;;  %v456_v15 = vpop.f32.mrf.mxu1  ;;  %v908_v9 = vunpack.c.h.bf16 %v923_v52  ;;  %v393_v10 = vadd.f32 %v1100_v30, %v1103_v38 }
  0xee   :  { %v888_v38 = vunpack.c.h.bf16 %v918_v5 }
  0xef   :  { %v572_v17 = vadd.f32 %v900_v11, %v484_v13  ;;  %v457_v18 = vadd.f32 %v456_v15, %v383_v14  ;;  %v887_v11 = vunpack.c.l.bf16 %v918_v5 }
  0xf1   :  { %v598_v20 = vmax.f32 %v572_v17, 0.0  ;;  %v561_v21 = vadd.f32 %v879_v16, %v457_v18  ;;  %v924_v17 = vld [vmem:[#allocation7 + $0x60] sm:$0xff]  }
  0xf2   :  { %v412_v22 = vpop.f32.mrf.mxu2 }
  0xf3   :  { %624 = vst [vmem:[#allocation8 + $0x98] sm:$0xff] %v598_v20  ;;  %v587_v23 = vmax.f32 %v561_v21, 0.0  ;;  %v413_v24 = vadd.f32 %v1100_v30, %v412_v22  ;;  %v491_v49 = vpop.f32.mrf.mxu3 }
  0xf4   :  { %v384_v26 = vpop.f32.mrf.mxu0 }
  0xf5   :  { %613 = vst [vmem:[#allocation8 + $0x40] sm:$0xff] %v587_v23  ;;  %v487_v28 = vadd.f32 %v486_v8, %v413_v24  ;;  %v385_v29 = vadd.f32 %v1100_v30, %v384_v26  ;;  %v458_v31 = vpop.f32.mrf.mxu1  ;;  %v911_v23 = vunpack.c.l.bf16 %v924_v17  ;;  %v395_v24 = vadd.f32 %v1100_v30, %v1106_v47 }
  0xf7   :  { %v573_v33 = vadd.f32 %v903_v25, %v487_v28  ;;  %v459_v34 = vadd.f32 %v458_v31, %v385_v29 }
  0xf9   :  { %v599_v35 = vmax.f32 %v573_v33, 0.0  ;;  %v562_v36 = vadd.f32 %v880_v32, %v459_v34 }
  0xfa   :  { %v414_v37 = vpop.f32.mrf.mxu2 }
  0xfb   :  { %625 = vst [vmem:[#allocation8 + $0xa0] sm:$0xff] %v599_v35  ;;  %v588_v40 = vmax.f32 %v562_v36, 0.0  ;;  %v415_v41 = vadd.f32 %v1100_v30, %v414_v37  ;;  %v493_v2 = vpop.f32.mrf.mxu3  ;;  %v912_v35 = vunpack.c.h.bf16 %v924_v17 }
  0xfc   :  { %v387_v43 = vpop.f32.mrf.mxu0 }
  0xfd   :  { %614 = vst [vmem:[#allocation8 + $0x48] sm:$0xff] %v588_v40  ;;  %v489_v44 = vadd.f32 %v488_v27, %v415_v41  ;;  %v388_v45 = vadd.f32 %v1100_v30, %v387_v43  ;;  %v461_v46 = vpop.f32.mrf.mxu1 }
  0xff   :  { %v574_v50 = vadd.f32 %v904_v42, %v489_v44  ;;  %v462_v51 = vadd.f32 %v461_v46, %v388_v45 }
 0x101   :  { %v600_v53 = vmax.f32 %v574_v50, 0.0  ;;  %v563_v54 = vadd.f32 %v883_v48, %v462_v51 }
 0x102   :  { %v417_v55 = vpop.f32.mrf.mxu2 }
 0x103   :  { %626 = vst [vmem:[#allocation8 + $0xa8] sm:$0xff] %v600_v53  ;;  %v589_v56 = vmax.f32 %v563_v54, 0.0  ;;  %v418_v57 = vadd.f32 %v1100_v30, %v417_v55  ;;  %v496_v20 = vpop.f32.mrf.mxu3 }
 0x104   :  { %v389_v59 = vpop.f32.mrf.mxu0 }
 0x105   :  { %615 = vst [vmem:[#allocation8 + $0x50] sm:$0xff] %v589_v56  ;;  %v492_v60 = vadd.f32 %v491_v49, %v418_v57  ;;  %v390_v61 = vadd.f32 %v1100_v30, %v389_v59  ;;  %v463_v62 = vpop.f32.mrf.mxu1 }
 0x107   :  { %v575_v0 = vadd.f32 %v907_v58, %v492_v60  ;;  %v464_v1 = vadd.f32 %v463_v62, %v390_v61 }
 0x109   :  { %v601_v3 = vmax.f32 %v575_v0, 0.0  ;;  %v564_v4 = vadd.f32 %v884_v63, %v464_v1 }
 0x10a   :  { %v419_v6 = vpop.f32.mrf.mxu2 }
 0x10b   :  { %627 = vst [vmem:[#allocation8 + $0xb0] sm:$0xff] %v601_v3  ;;  %v590_v7 = vmax.f32 %v564_v4, 0.0  ;;  %v420_v8 = vadd.f32 %v1100_v30, %v419_v6  ;;  %v498_v36 = vpop.f32.mrf.mxu3 }
 0x10d   :  { %616 = vst [vmem:[#allocation8 + $0x58] sm:$0xff] %v590_v7  ;;  %v494_v12 = vadd.f32 %v493_v2, %v420_v8  ;;  %v466_v13 = vpop.f32.mrf.mxu1 }
 0x10e   :  { %v467_v14 = vadd.f32 %v466_v13, %v393_v10 }
 0x10f   :  { %v576_v15 = vadd.f32 %v908_v9, %v494_v12 }
 0x110   :  { %v565_v16 = vadd.f32 %v887_v11, %v467_v14 }
 0x111   :  { %v602_v18 = vmax.f32 %v576_v15, 0.0 }
 0x112   :  { %v591_v19 = vmax.f32 %v565_v16, 0.0  ;;  %v422_v21 = vpop.f32.mrf.mxu2 }
 0x113   :  { %628 = vst [vmem:[#allocation8 + $0xb8] sm:$0xff] %v602_v18  ;;  %v423_v22 = vadd.f32 %v1100_v30, %v422_v21 }
 0x114   :  { %617 = vst [vmem:[#allocation8 + $0x60] sm:$0xff] %v591_v19 }
 0x115   :  { %v497_v25 = vadd.f32 %v496_v20, %v423_v22  ;;  %v468_v26 = vpop.f32.mrf.mxu1 }
 0x116   :  { %v469_v27 = vadd.f32 %v468_v26, %v395_v24 }
 0x117   :  { %v577_v28 = vadd.f32 %v911_v23, %v497_v25 }
 0x118   :  { %v566_v29 = vadd.f32 %v888_v38, %v469_v27 }
 0x119   :  { %v603_v31 = vmax.f32 %v577_v28, 0.0 }
 0x11a   :  { %v592_v32 = vmax.f32 %v566_v29, 0.0  ;;  %v424_v33 = vpop.f32.mrf.mxu2 }
 0x11b   :  { %629 = vst [vmem:[#allocation8 + $0xc0] sm:$0xff] %v603_v31  ;;  %v425_v34 = vadd.f32 %v1100_v30, %v424_v33 }
 0x11c   :  { %618 = vst [vmem:[#allocation8 + $0x68] sm:$0xff] %v592_v32 }
 0x11d   :  { %v499_v37 = vadd.f32 %v498_v36, %v425_v34 }
 0x11f   :  { %v578_v47 = vadd.f32 %v912_v35, %v499_v37 }
 0x121   :  { %v604_v39 = vmax.f32 %v578_v47, 0.0 }
 0x123   :  { %630 = vst [vmem:[#allocation8 + $0xc8] sm:$0xff] %v604_v39 }
 0x124   :  { %643 = dma.vmem_to_hbm [thread:$0]  %s636_s7, 3328, %s638_s10, [#allocation4], %s1056_s27, %s1056_s27, %s1057_s28  }
 0x125   :  { %1050 = dma.done.wait [#allocation4], 3328  }
 0x126   :  { %1051 = vsyncadd [#allocation4], 4294963968 }
 0x127   :  { %648 = vsyncpa [#allocation3], 1 }
 0x128   :  { %649 = vsyncpa [#allocation6], 1 }
 0x129   :  { %650 = vsyncpa [#allocation4], 1 }

</bundles_post_ra>
